<compile_context>
chip_gen: v7x
topology: tpu7x:2x2x1
jax: 0.10.0
libtpu: 0.0.40
codegen_flags: <defaults>
</compile_context>

<pallas_src>
import math

import jax
import jax.numpy as jnp
from jax.experimental import pallas as pl
from jax.experimental.pallas import tpu as pltpu

# ---------------- model hyper-parameters (small, synthetic) -----------------
BATCH = 16         # number of rows in x / flattened z
INPUT_DIM = 8      # args.input_dim  (feature dimension of x)
ZDIM = 4           # args.zdim       (context dimension)
HIDDEN = 32        # hidden width of the per-layer conditioner MLP
NUM_LAYERS = 4     # number of coupling layers in the flow


# ------------------------------ Pallas kernel -------------------------------
def reco_flow_kernel(xT_ref, ctxT_ref, mask_ref, w1x_ref, w1c_ref, b1_ref,
                     w2_ref, b2_ref, out_ref):
    """Per-tile log_prob(x|ctx) in batch-on-lanes layout.

    xT_ref  : (D, TB)  f32   activations, batch on lanes
    ctxT_ref: (Z, TB)  f32
    mask_ref: (L, D, 1) f32  binary coupling masks
    w1x_ref : (L, H, D) bf16 conditioner input weights (pre-transposed)
    w1c_ref : (L*H, Z)  bf16 context weights for ALL layers (stacked)
    b1_ref  : (L, H, 1) f32
    w2_ref  : (L, 2D, H) bf16 fused s/t head (pre-transposed)
    b2_ref  : (L, 2D, 1) f32
    out_ref : (1, TB)   f32  per-sample log_px
    """
    u = xT_ref[...].astype(jnp.float32)                      # (D, TB)
    D, TB = u.shape
    L = mask_ref.shape[0]
    H = b1_ref.shape[1]

    # Hoisted, loop-invariant context projection: one MXU pass for all layers.
    ctx_bf = ctxT_ref[...].astype(jnp.bfloat16)              # (Z, TB)
    ctx_proj = jnp.dot(w1c_ref[...], ctx_bf,
                       preferred_element_type=jnp.float32)   # (L*H, TB)

    logdet = jnp.zeros((1, TB), dtype=jnp.float32)
    half_log2pi = jnp.float32(0.5 * math.log(2.0 * math.pi))

    # L is small & fixed -> static unroll (switch to lax.fori_loop(unroll=True)
    # with dynamic weight indexing if NUM_LAYERS grows).
    for layer in range(L):
        m = mask_ref[layer]                                   # (D, 1)
        inv_m = 1.0 - m

        # Conditioner hidden layer: (H, D) @ (D, TB) on the MXU, bf16 operands.
        xm = (u * m).astype(jnp.bfloat16)                     # (D, TB)
        h = jnp.maximum(
            jnp.dot(w1x_ref[layer], xm, preferred_element_type=jnp.float32)
            + ctx_proj[layer * H:(layer + 1) * H, :]
            + b1_ref[layer], 0.0)                             # (H, TB) f32

        # Fused s/t heads: one (2D, H) @ (H, TB) matmul, split on sublanes.
        st = (jnp.dot(w2_ref[layer], h.astype(jnp.bfloat16),
                      preferred_element_type=jnp.float32)
              + b2_ref[layer])                                # (2D, TB)
        s = jnp.tanh(st[:D, :])                               # (D, TB)
        t = st[D:, :]                                         # (D, TB)

        # Data -> noise direction of the affine coupling transform (f32).
        u = u * m + inv_m * (u - t) * jnp.exp(-s)
        logdet = logdet - jnp.sum(inv_m * s, axis=0, keepdims=True)  # (1, TB)

    # Standard-normal base log density.
    log_base = (-0.5 * jnp.sum(u * u, axis=0, keepdims=True)
                - jnp.float32(D) * half_log2pi)               # (1, TB)
    out_ref[...] = log_base + logdet                          # per-sample log_px


# ------------------------------- JAX wrapper ---------------------------------
def init_params(key, input_dim, zdim, hidden, num_layers):
    """Deterministic synthetic flow parameters, packed feature-major for the kernel."""
    ks = jax.random.split(key, 7)
    scale = 0.2
    w1x = scale * jax.random.normal(ks[0], (num_layers, input_dim, hidden), jnp.float32)
    w1c = scale * jax.random.normal(ks[1], (num_layers, zdim, hidden), jnp.float32)
    b1 = scale * jax.random.normal(ks[2], (num_layers, 1, hidden), jnp.float32)
    w2s = scale * jax.random.normal(ks[3], (num_layers, hidden, input_dim), jnp.float32)
    b2s = scale * jax.random.normal(ks[4], (num_layers, 1, input_dim), jnp.float32)
    w2t = scale * jax.random.normal(ks[5], (num_layers, hidden, input_dim), jnp.float32)
    b2t = scale * jax.random.normal(ks[6], (num_layers, 1, input_dim), jnp.float32)

    n_params = int(w1x.size + w1c.size + b1.size + w2s.size + b2s.size
                   + w2t.size + b2t.size)

    # Alternating binary coupling masks, feature-major: (L, D, 1).
    idx = jnp.arange(input_dim)
    masks = jnp.stack(
        [((idx + l) % 2).astype(jnp.float32)[:, None] for l in range(num_layers)],
        axis=0)

    # Pre-transpose / pre-fuse for the batch-on-lanes kernel layout.
    params = dict(
        mask=masks,                                                        # (L, D, 1)
        w1x_t=jnp.transpose(w1x, (0, 2, 1)).astype(jnp.bfloat16),          # (L, H, D)
        w1c_t=jnp.transpose(w1c, (0, 2, 1))
                 .reshape(num_layers * hidden, zdim).astype(jnp.bfloat16), # (L*H, Z)
        b1_t=jnp.transpose(b1, (0, 2, 1)),                                 # (L, H, 1)
        w2_t=jnp.transpose(jnp.concatenate([w2s, w2t], axis=-1),
                           (0, 2, 1)).astype(jnp.bfloat16),                # (L, 2D, H)
        b2_t=jnp.transpose(jnp.concatenate([b2s, b2t], axis=-1),
                           (0, 2, 1)),                                     # (L, 2D, 1)
    )
    return params, n_params


def reco_flow_forward(x, z, params, *, zdim=ZDIM, tile_b=None):
    """Equivalent of RecoFlow.forward(..., val=True) -> posterior_nats (scalar)."""
    ctx = z.reshape(-1, zdim)        # z.view(-1, self.zdim)
    B, D = x.shape
    Z = ctx.shape[-1]
    L, H, _ = params["b1_t"].shape

    # Whole batch in one tile for the small demo; >=256 (multiple of 128) for
    # real workloads so batch tiles are lane-dense and MXU N is large.
    if tile_b is None:
        tile_b = B if B <= 256 else 256
    assert B % tile_b == 0, "batch must be divisible by the batch tile"
    nb = B // tile_b

    # Batch-on-lanes: transpose once in the wrapper (layout plumbing).
    xT = x.T                          # (D, B)
    ctxT = ctx.T                      # (Z, B)

    # Resident weights use a constant index_map (fetched once).  On v7x add
    # pipeline_mode=pl.Buffered(1) to these specs to stop double-buffering
    # them when INPUT_DIM/HIDDEN are large (64 MiB VMEM budget).
    log_px = pl.pallas_call(
        reco_flow_kernel,
        out_shape=jax.ShapeDtypeStruct((1, B), jnp.float32),
        grid_spec=pltpu.PrefetchScalarGridSpec(
            num_scalar_prefetch=0,
            grid=(nb,),
            in_specs=[
                # batch-tiled activations (double-buffered by BlockSpec)
                pl.BlockSpec((D, tile_b), lambda i: (0, i)),
                pl.BlockSpec((Z, tile_b), lambda i: (0, i)),
                # resident weights / masks
                pl.BlockSpec((L, D, 1), lambda i: (0, 0, 0)),
                pl.BlockSpec((L, H, D), lambda i: (0, 0, 0)),
                pl.BlockSpec((L * H, Z), lambda i: (0, 0)),
                pl.BlockSpec((L, H, 1), lambda i: (0, 0, 0)),
                pl.BlockSpec((L, 2 * D, H), lambda i: (0, 0, 0)),
                pl.BlockSpec((L, 2 * D, 1), lambda i: (0, 0, 0)),
            ],
            # Disjoint per-tile output blocks -> no carried state across the
            # grid, so the batch axis can be "parallel" (megacore-friendly).
            out_specs=pl.BlockSpec((1, tile_b), lambda i: (0, i)),
        ),
        compiler_params=pltpu.CompilerParams(
            dimension_semantics=("parallel",),
            # Raise for large TILE_B; keep well under 64 MiB on v7x.
            vmem_limit_bytes=32 * 1024 * 1024),
    )(xT, ctxT, params["mask"], params["w1x_t"], params["w1c_t"],
      params["b1_t"], params["w2_t"], params["b2_t"])

    # posterior_nats = -mean(log_px) / input_dim = -sum(log_px) / (B * D)
    return -jnp.sum(log_px) / jnp.float32(B * D)


# ----------------------------------- main ------------------------------------
if __name__ == "__main__":
    key = jax.random.PRNGKey(0)
    k_param, k_x, k_z = jax.random.split(key, 3)

    params, n_params = init_params(k_param, INPUT_DIM, ZDIM, HIDDEN, NUM_LAYERS)
    print("Total params: ", n_params)

    x = jax.random.normal(k_x, (BATCH, INPUT_DIM), jnp.float32)
    # z comes in with an extra axis to exercise the z.view(-1, zdim) reshape.
    z = jax.random.normal(k_z, (BATCH, 1, ZDIM), jnp.float32)

    posterior_nats = reco_flow_forward(x, z, params)
    posterior_nats = jax.block_until_ready(posterior_nats)

    print("KERNEL_OK")
</pallas_src>

<mosaic_0001>
module attributes {stable_mosaic.version = 11 : i64} {
  func.func @reco_flow_kernel(%arg0: i32, %arg1: memref<8x16xf32, #tpu.memory_space<vmem>>, %arg2: memref<4x16xf32, #tpu.memory_space<vmem>>, %arg3: memref<4x8x1xf32, #tpu.memory_space<vmem>>, %arg4: memref<4x32x8xbf16, #tpu.memory_space<vmem>>, %arg5: memref<128x4xbf16, #tpu.memory_space<vmem>>, %arg6: memref<4x32x1xf32, #tpu.memory_space<vmem>>, %arg7: memref<4x16x32xbf16, #tpu.memory_space<vmem>>, %arg8: memref<4x16x1xf32, #tpu.memory_space<vmem>>, %arg9: memref<1x16xf32, #tpu.memory_space<vmem>>) attributes {dimension_semantics = [#tpu.dimension_semantics<parallel>], iteration_bounds = array<i64: 1>, scalar_prefetch = 0 : i64, scratch_operands = 0 : i64, tpu.core_type = #tpu.core_type<tc>, window_params = [{transform_indices = @transform_0, window_bounds = array<i64: 8, 16>}, {transform_indices = @transform_1, window_bounds = array<i64: 4, 16>}, {pipeline_mode = #tpu.pipeline_mode<synchronous>, transform_indices = @transform_2, window_bounds = array<i64: 4, 8, 1>}, {pipeline_mode = #tpu.pipeline_mode<synchronous>, transform_indices = @transform_3, window_bounds = array<i64: 4, 32, 8>}, {pipeline_mode = #tpu.pipeline_mode<synchronous>, transform_indices = @transform_4, window_bounds = array<i64: 128, 4>}, {pipeline_mode = #tpu.pipeline_mode<synchronous>, transform_indices = @transform_5, window_bounds = array<i64: 4, 32, 1>}, {pipeline_mode = #tpu.pipeline_mode<synchronous>, transform_indices = @transform_6, window_bounds = array<i64: 4, 16, 32>}, {pipeline_mode = #tpu.pipeline_mode<synchronous>, transform_indices = @transform_7, window_bounds = array<i64: 4, 16, 1>}, {transform_indices = @transform_8, window_bounds = array<i64: 1, 16>}]} {
    %c0 = arith.constant 0 : index
    %c0_0 = arith.constant 0 : index
    %0 = vector.load %arg1[%c0, %c0_0] : memref<8x16xf32, #tpu.memory_space<vmem>>, vector<8x16xf32>
    %c0_1 = arith.constant 0 : index
    %c0_2 = arith.constant 0 : index
    %1 = vector.load %arg2[%c0_1, %c0_2] : memref<4x16xf32, #tpu.memory_space<vmem>>, vector<4x16xf32>
    %2 = arith.truncf %1 : vector<4x16xf32> to vector<4x16xbf16>
    %c0_3 = arith.constant 0 : index
    %c0_4 = arith.constant 0 : index
    %3 = vector.load %arg5[%c0_3, %c0_4] : memref<128x4xbf16, #tpu.memory_space<vmem>>, vector<128x4xbf16>
    %cst = arith.constant dense<0.000000e+00> : vector<128x16xf32>
    %4 = tpu.matmul %3, %2, %cst {dimension_numbers = #tpu.dot_dimension_numbers<[1], [0], [0], [1], [0, 0, 1, 1], [], []>} : vector<128x4xbf16>, vector<4x16xbf16>, vector<128x16xf32> -> vector<128x16xf32>
    %cst_5 = arith.constant 0.000000e+00 : f32
    %5 = vector.broadcast %cst_5 : f32 to vector<1x16xf32>
    %c0_6 = arith.constant 0 : index
    %c0_7 = arith.constant 0 : index
    %c0_8 = arith.constant 0 : index
    %6 = vector.load %arg3[%c0_6, %c0_7, %c0_8] : memref<4x8x1xf32, #tpu.memory_space<vmem>>, vector<1x8x1xf32>
    %7 = vector.shape_cast %6 : vector<1x8x1xf32> to vector<8x1xf32>
    %cst_9 = arith.constant 1.000000e+00 : f32
    %8 = vector.broadcast %cst_9 : f32 to vector<8x1xf32>
    %9 = arith.subf %8, %7 : vector<8x1xf32>
    %10 = vector.broadcast %7 : vector<8x1xf32> to vector<8x16xf32>
    %11 = arith.mulf %0, %10 : vector<8x16xf32>
    %12 = arith.truncf %11 : vector<8x16xf32> to vector<8x16xbf16>
    %c0_10 = arith.constant 0 : index
    %c0_11 = arith.constant 0 : index
    %c0_12 = arith.constant 0 : index
    %13 = vector.load %arg4[%c0_10, %c0_11, %c0_12] : memref<4x32x8xbf16, #tpu.memory_space<vmem>>, vector<1x32x8xbf16>
    %14 = vector.shape_cast %13 : vector<1x32x8xbf16> to vector<32x8xbf16>
    %cst_13 = arith.constant dense<0.000000e+00> : vector<32x16xf32>
    %15 = tpu.matmul %14, %12, %cst_13 {dimension_numbers = #tpu.dot_dimension_numbers<[1], [0], [0], [1], [0, 0, 1, 1], [], []>} : vector<32x8xbf16>, vector<8x16xbf16>, vector<32x16xf32> -> vector<32x16xf32>
    %16 = vector.extract_strided_slice %4 {offsets = [0, 0], sizes = [32, 16], strides = [1, 1]} : vector<128x16xf32> to vector<32x16xf32>
    %17 = arith.addf %15, %16 : vector<32x16xf32>
    %c0_14 = arith.constant 0 : index
    %c0_15 = arith.constant 0 : index
    %c0_16 = arith.constant 0 : index
    %18 = vector.load %arg6[%c0_14, %c0_15, %c0_16] : memref<4x32x1xf32, #tpu.memory_space<vmem>>, vector<1x32x1xf32>
    %19 = vector.shape_cast %18 : vector<1x32x1xf32> to vector<32x1xf32>
    %20 = vector.broadcast %19 : vector<32x1xf32> to vector<32x16xf32>
    %21 = arith.addf %17, %20 : vector<32x16xf32>
    %cst_17 = arith.constant 0.000000e+00 : f32
    %22 = vector.broadcast %cst_17 : f32 to vector<32x16xf32>
    %23 = arith.maximumf %21, %22 : vector<32x16xf32>
    %c0_18 = arith.constant 0 : index
    %c0_19 = arith.constant 0 : index
    %c0_20 = arith.constant 0 : index
    %24 = vector.load %arg7[%c0_18, %c0_19, %c0_20] : memref<4x16x32xbf16, #tpu.memory_space<vmem>>, vector<1x16x32xbf16>
    %25 = vector.shape_cast %24 : vector<1x16x32xbf16> to vector<16x32xbf16>
    %26 = arith.truncf %23 : vector<32x16xf32> to vector<32x16xbf16>
    %cst_21 = arith.constant dense<0.000000e+00> : vector<16x16xf32>
    %27 = tpu.matmul %25, %26, %cst_21 {dimension_numbers = #tpu.dot_dimension_numbers<[1], [0], [0], [1], [0, 0, 1, 1], [], []>} : vector<16x32xbf16>, vector<32x16xbf16>, vector<16x16xf32> -> vector<16x16xf32>
    %c0_22 = arith.constant 0 : index
    %c0_23 = arith.constant 0 : index
    %c0_24 = arith.constant 0 : index
    %28 = vector.load %arg8[%c0_22, %c0_23, %c0_24] : memref<4x16x1xf32, #tpu.memory_space<vmem>>, vector<1x16x1xf32>
    %29 = vector.shape_cast %28 : vector<1x16x1xf32> to vector<16x1xf32>
    %30 = vector.broadcast %29 : vector<16x1xf32> to vector<16x16xf32>
    %31 = arith.addf %27, %30 : vector<16x16xf32>
    %32 = vector.extract_strided_slice %31 {offsets = [0, 0], sizes = [8, 16], strides = [1, 1]} : vector<16x16xf32> to vector<8x16xf32>
    %33 = math.tanh %32 : vector<8x16xf32>
    %34 = vector.extract_strided_slice %31 {offsets = [8, 0], sizes = [8, 16], strides = [1, 1]} : vector<16x16xf32> to vector<8x16xf32>
    %35 = vector.broadcast %7 : vector<8x1xf32> to vector<8x16xf32>
    %36 = arith.mulf %0, %35 : vector<8x16xf32>
    %37 = arith.subf %0, %34 : vector<8x16xf32>
    %38 = vector.broadcast %9 : vector<8x1xf32> to vector<8x16xf32>
    %39 = arith.mulf %38, %37 : vector<8x16xf32>
    %cst_25 = arith.constant 0.000000e+00 : f32
    %40 = vector.broadcast %cst_25 : f32 to vector<8x16xf32>
    %41 = arith.subf %40, %33 : vector<8x16xf32>
    %42 = math.exp %41 : vector<8x16xf32>
    %43 = arith.mulf %39, %42 : vector<8x16xf32>
    %44 = arith.addf %36, %43 : vector<8x16xf32>
    %45 = vector.broadcast %9 : vector<8x1xf32> to vector<8x16xf32>
    %46 = arith.mulf %45, %33 : vector<8x16xf32>
    %cst_26 = arith.constant dense<0.000000e+00> : vector<16xf32>
    %47 = vector.multi_reduction <add>, %46, %cst_26 [0] : vector<8x16xf32> to vector<16xf32>
    %48 = vector.shape_cast %47 : vector<16xf32> to vector<1x16xf32>
    %49 = arith.subf %5, %48 : vector<1x16xf32>
    %c1 = arith.constant 1 : index
    %c0_27 = arith.constant 0 : index
    %c0_28 = arith.constant 0 : index
    %50 = vector.load %arg3[%c1, %c0_27, %c0_28] : memref<4x8x1xf32, #tpu.memory_space<vmem>>, vector<1x8x1xf32>
    %51 = vector.shape_cast %50 : vector<1x8x1xf32> to vector<8x1xf32>
    %cst_29 = arith.constant 1.000000e+00 : f32
    %52 = vector.broadcast %cst_29 : f32 to vector<8x1xf32>
    %53 = arith.subf %52, %51 : vector<8x1xf32>
    %54 = vector.broadcast %51 : vector<8x1xf32> to vector<8x16xf32>
    %55 = arith.mulf %44, %54 : vector<8x16xf32>
    %56 = arith.truncf %55 : vector<8x16xf32> to vector<8x16xbf16>
    %c1_30 = arith.constant 1 : index
    %c0_31 = arith.constant 0 : index
    %c0_32 = arith.constant 0 : index
    %57 = vector.load %arg4[%c1_30, %c0_31, %c0_32] : memref<4x32x8xbf16, #tpu.memory_space<vmem>>, vector<1x32x8xbf16>
    %58 = vector.shape_cast %57 : vector<1x32x8xbf16> to vector<32x8xbf16>
    %cst_33 = arith.constant dense<0.000000e+00> : vector<32x16xf32>
    %59 = tpu.matmul %58, %56, %cst_33 {dimension_numbers = #tpu.dot_dimension_numbers<[1], [0], [0], [1], [0, 0, 1, 1], [], []>} : vector<32x8xbf16>, vector<8x16xbf16>, vector<32x16xf32> -> vector<32x16xf32>
    %60 = vector.extract_strided_slice %4 {offsets = [32, 0], sizes = [32, 16], strides = [1, 1]} : vector<128x16xf32> to vector<32x16xf32>
    %61 = arith.addf %59, %60 : vector<32x16xf32>
    %c1_34 = arith.constant 1 : index
    %c0_35 = arith.constant 0 : index
    %c0_36 = arith.constant 0 : index
    %62 = vector.load %arg6[%c1_34, %c0_35, %c0_36] : memref<4x32x1xf32, #tpu.memory_space<vmem>>, vector<1x32x1xf32>
    %63 = vector.shape_cast %62 : vector<1x32x1xf32> to vector<32x1xf32>
    %64 = vector.broadcast %63 : vector<32x1xf32> to vector<32x16xf32>
    %65 = arith.addf %61, %64 : vector<32x16xf32>
    %cst_37 = arith.constant 0.000000e+00 : f32
    %66 = vector.broadcast %cst_37 : f32 to vector<32x16xf32>
    %67 = arith.maximumf %65, %66 : vector<32x16xf32>
    %c1_38 = arith.constant 1 : index
    %c0_39 = arith.constant 0 : index
    %c0_40 = arith.constant 0 : index
    %68 = vector.load %arg7[%c1_38, %c0_39, %c0_40] : memref<4x16x32xbf16, #tpu.memory_space<vmem>>, vector<1x16x32xbf16>
    %69 = vector.shape_cast %68 : vector<1x16x32xbf16> to vector<16x32xbf16>
    %70 = arith.truncf %67 : vector<32x16xf32> to vector<32x16xbf16>
    %cst_41 = arith.constant dense<0.000000e+00> : vector<16x16xf32>
    %71 = tpu.matmul %69, %70, %cst_41 {dimension_numbers = #tpu.dot_dimension_numbers<[1], [0], [0], [1], [0, 0, 1, 1], [], []>} : vector<16x32xbf16>, vector<32x16xbf16>, vector<16x16xf32> -> vector<16x16xf32>
    %c1_42 = arith.constant 1 : index
    %c0_43 = arith.constant 0 : index
    %c0_44 = arith.constant 0 : index
    %72 = vector.load %arg8[%c1_42, %c0_43, %c0_44] : memref<4x16x1xf32, #tpu.memory_space<vmem>>, vector<1x16x1xf32>
    %73 = vector.shape_cast %72 : vector<1x16x1xf32> to vector<16x1xf32>
    %74 = vector.broadcast %73 : vector<16x1xf32> to vector<16x16xf32>
    %75 = arith.addf %71, %74 : vector<16x16xf32>
    %76 = vector.extract_strided_slice %75 {offsets = [0, 0], sizes = [8, 16], strides = [1, 1]} : vector<16x16xf32> to vector<8x16xf32>
    %77 = math.tanh %76 : vector<8x16xf32>
    %78 = vector.extract_strided_slice %75 {offsets = [8, 0], sizes = [8, 16], strides = [1, 1]} : vector<16x16xf32> to vector<8x16xf32>
    %79 = vector.broadcast %51 : vector<8x1xf32> to vector<8x16xf32>
    %80 = arith.mulf %44, %79 : vector<8x16xf32>
    %81 = arith.subf %44, %78 : vector<8x16xf32>
    %82 = vector.broadcast %53 : vector<8x1xf32> to vector<8x16xf32>
    %83 = arith.mulf %82, %81 : vector<8x16xf32>
    %cst_45 = arith.constant 0.000000e+00 : f32
    %84 = vector.broadcast %cst_45 : f32 to vector<8x16xf32>
    %85 = arith.subf %84, %77 : vector<8x16xf32>
    %86 = math.exp %85 : vector<8x16xf32>
    %87 = arith.mulf %83, %86 : vector<8x16xf32>
    %88 = arith.addf %80, %87 : vector<8x16xf32>
    %89 = vector.broadcast %53 : vector<8x1xf32> to vector<8x16xf32>
    %90 = arith.mulf %89, %77 : vector<8x16xf32>
    %cst_46 = arith.constant dense<0.000000e+00> : vector<16xf32>
    %91 = vector.multi_reduction <add>, %90, %cst_46 [0] : vector<8x16xf32> to vector<16xf32>
    %92 = vector.shape_cast %91 : vector<16xf32> to vector<1x16xf32>
    %93 = arith.subf %49, %92 : vector<1x16xf32>
    %c2 = arith.constant 2 : index
    %c0_47 = arith.constant 0 : index
    %c0_48 = arith.constant 0 : index
    %94 = vector.load %arg3[%c2, %c0_47, %c0_48] : memref<4x8x1xf32, #tpu.memory_space<vmem>>, vector<1x8x1xf32>
    %95 = vector.shape_cast %94 : vector<1x8x1xf32> to vector<8x1xf32>
    %cst_49 = arith.constant 1.000000e+00 : f32
    %96 = vector.broadcast %cst_49 : f32 to vector<8x1xf32>
    %97 = arith.subf %96, %95 : vector<8x1xf32>
    %98 = vector.broadcast %95 : vector<8x1xf32> to vector<8x16xf32>
    %99 = arith.mulf %88, %98 : vector<8x16xf32>
    %100 = arith.truncf %99 : vector<8x16xf32> to vector<8x16xbf16>
    %c2_50 = arith.constant 2 : index
    %c0_51 = arith.constant 0 : index
    %c0_52 = arith.constant 0 : index
    %101 = vector.load %arg4[%c2_50, %c0_51, %c0_52] : memref<4x32x8xbf16, #tpu.memory_space<vmem>>, vector<1x32x8xbf16>
    %102 = vector.shape_cast %101 : vector<1x32x8xbf16> to vector<32x8xbf16>
    %cst_53 = arith.constant dense<0.000000e+00> : vector<32x16xf32>
    %103 = tpu.matmul %102, %100, %cst_53 {dimension_numbers = #tpu.dot_dimension_numbers<[1], [0], [0], [1], [0, 0, 1, 1], [], []>} : vector<32x8xbf16>, vector<8x16xbf16>, vector<32x16xf32> -> vector<32x16xf32>
    %104 = vector.extract_strided_slice %4 {offsets = [64, 0], sizes = [32, 16], strides = [1, 1]} : vector<128x16xf32> to vector<32x16xf32>
    %105 = arith.addf %103, %104 : vector<32x16xf32>
    %c2_54 = arith.constant 2 : index
    %c0_55 = arith.constant 0 : index
    %c0_56 = arith.constant 0 : index
    %106 = vector.load %arg6[%c2_54, %c0_55, %c0_56] : memref<4x32x1xf32, #tpu.memory_space<vmem>>, vector<1x32x1xf32>
    %107 = vector.shape_cast %106 : vector<1x32x1xf32> to vector<32x1xf32>
    %108 = vector.broadcast %107 : vector<32x1xf32> to vector<32x16xf32>
    %109 = arith.addf %105, %108 : vector<32x16xf32>
    %cst_57 = arith.constant 0.000000e+00 : f32
    %110 = vector.broadcast %cst_57 : f32 to vector<32x16xf32>
    %111 = arith.maximumf %109, %110 : vector<32x16xf32>
    %c2_58 = arith.constant 2 : index
    %c0_59 = arith.constant 0 : index
    %c0_60 = arith.constant 0 : index
    %112 = vector.load %arg7[%c2_58, %c0_59, %c0_60] : memref<4x16x32xbf16, #tpu.memory_space<vmem>>, vector<1x16x32xbf16>
    %113 = vector.shape_cast %112 : vector<1x16x32xbf16> to vector<16x32xbf16>
    %114 = arith.truncf %111 : vector<32x16xf32> to vector<32x16xbf16>
    %cst_61 = arith.constant dense<0.000000e+00> : vector<16x16xf32>
    %115 = tpu.matmul %113, %114, %cst_61 {dimension_numbers = #tpu.dot_dimension_numbers<[1], [0], [0], [1], [0, 0, 1, 1], [], []>} : vector<16x32xbf16>, vector<32x16xbf16>, vector<16x16xf32> -> vector<16x16xf32>
    %c2_62 = arith.constant 2 : index
    %c0_63 = arith.constant 0 : index
    %c0_64 = arith.constant 0 : index
    %116 = vector.load %arg8[%c2_62, %c0_63, %c0_64] : memref<4x16x1xf32, #tpu.memory_space<vmem>>, vector<1x16x1xf32>
    %117 = vector.shape_cast %116 : vector<1x16x1xf32> to vector<16x1xf32>
    %118 = vector.broadcast %117 : vector<16x1xf32> to vector<16x16xf32>
    %119 = arith.addf %115, %118 : vector<16x16xf32>
    %120 = vector.extract_strided_slice %119 {offsets = [0, 0], sizes = [8, 16], strides = [1, 1]} : vector<16x16xf32> to vector<8x16xf32>
    %121 = math.tanh %120 : vector<8x16xf32>
    %122 = vector.extract_strided_slice %119 {offsets = [8, 0], sizes = [8, 16], strides = [1, 1]} : vector<16x16xf32> to vector<8x16xf32>
    %123 = vector.broadcast %95 : vector<8x1xf32> to vector<8x16xf32>
    %124 = arith.mulf %88, %123 : vector<8x16xf32>
    %125 = arith.subf %88, %122 : vector<8x16xf32>
    %126 = vector.broadcast %97 : vector<8x1xf32> to vector<8x16xf32>
    %127 = arith.mulf %126, %125 : vector<8x16xf32>
    %cst_65 = arith.constant 0.000000e+00 : f32
    %128 = vector.broadcast %cst_65 : f32 to vector<8x16xf32>
    %129 = arith.subf %128, %121 : vector<8x16xf32>
    %130 = math.exp %129 : vector<8x16xf32>
    %131 = arith.mulf %127, %130 : vector<8x16xf32>
    %132 = arith.addf %124, %131 : vector<8x16xf32>
    %133 = vector.broadcast %97 : vector<8x1xf32> to vector<8x16xf32>
    %134 = arith.mulf %133, %121 : vector<8x16xf32>
    %cst_66 = arith.constant dense<0.000000e+00> : vector<16xf32>
    %135 = vector.multi_reduction <add>, %134, %cst_66 [0] : vector<8x16xf32> to vector<16xf32>
    %136 = vector.shape_cast %135 : vector<16xf32> to vector<1x16xf32>
    %137 = arith.subf %93, %136 : vector<1x16xf32>
    %c3 = arith.constant 3 : index
    %c0_67 = arith.constant 0 : index
    %c0_68 = arith.constant 0 : index
    %138 = vector.load %arg3[%c3, %c0_67, %c0_68] : memref<4x8x1xf32, #tpu.memory_space<vmem>>, vector<1x8x1xf32>
    %139 = vector.shape_cast %138 : vector<1x8x1xf32> to vector<8x1xf32>
    %cst_69 = arith.constant 1.000000e+00 : f32
    %140 = vector.broadcast %cst_69 : f32 to vector<8x1xf32>
    %141 = arith.subf %140, %139 : vector<8x1xf32>
    %142 = vector.broadcast %139 : vector<8x1xf32> to vector<8x16xf32>
    %143 = arith.mulf %132, %142 : vector<8x16xf32>
    %144 = arith.truncf %143 : vector<8x16xf32> to vector<8x16xbf16>
    %c3_70 = arith.constant 3 : index
    %c0_71 = arith.constant 0 : index
    %c0_72 = arith.constant 0 : index
    %145 = vector.load %arg4[%c3_70, %c0_71, %c0_72] : memref<4x32x8xbf16, #tpu.memory_space<vmem>>, vector<1x32x8xbf16>
    %146 = vector.shape_cast %145 : vector<1x32x8xbf16> to vector<32x8xbf16>
    %cst_73 = arith.constant dense<0.000000e+00> : vector<32x16xf32>
    %147 = tpu.matmul %146, %144, %cst_73 {dimension_numbers = #tpu.dot_dimension_numbers<[1], [0], [0], [1], [0, 0, 1, 1], [], []>} : vector<32x8xbf16>, vector<8x16xbf16>, vector<32x16xf32> -> vector<32x16xf32>
    %148 = vector.extract_strided_slice %4 {offsets = [96, 0], sizes = [32, 16], strides = [1, 1]} : vector<128x16xf32> to vector<32x16xf32>
    %149 = arith.addf %147, %148 : vector<32x16xf32>
    %c3_74 = arith.constant 3 : index
    %c0_75 = arith.constant 0 : index
    %c0_76 = arith.constant 0 : index
    %150 = vector.load %arg6[%c3_74, %c0_75, %c0_76] : memref<4x32x1xf32, #tpu.memory_space<vmem>>, vector<1x32x1xf32>
    %151 = vector.shape_cast %150 : vector<1x32x1xf32> to vector<32x1xf32>
    %152 = vector.broadcast %151 : vector<32x1xf32> to vector<32x16xf32>
    %153 = arith.addf %149, %152 : vector<32x16xf32>
    %cst_77 = arith.constant 0.000000e+00 : f32
    %154 = vector.broadcast %cst_77 : f32 to vector<32x16xf32>
    %155 = arith.maximumf %153, %154 : vector<32x16xf32>
    %c3_78 = arith.constant 3 : index
    %c0_79 = arith.constant 0 : index
    %c0_80 = arith.constant 0 : index
    %156 = vector.load %arg7[%c3_78, %c0_79, %c0_80] : memref<4x16x32xbf16, #tpu.memory_space<vmem>>, vector<1x16x32xbf16>
    %157 = vector.shape_cast %156 : vector<1x16x32xbf16> to vector<16x32xbf16>
    %158 = arith.truncf %155 : vector<32x16xf32> to vector<32x16xbf16>
    %cst_81 = arith.constant dense<0.000000e+00> : vector<16x16xf32>
    %159 = tpu.matmul %157, %158, %cst_81 {dimension_numbers = #tpu.dot_dimension_numbers<[1], [0], [0], [1], [0, 0, 1, 1], [], []>} : vector<16x32xbf16>, vector<32x16xbf16>, vector<16x16xf32> -> vector<16x16xf32>
    %c3_82 = arith.constant 3 : index
    %c0_83 = arith.constant 0 : index
    %c0_84 = arith.constant 0 : index
    %160 = vector.load %arg8[%c3_82, %c0_83, %c0_84] : memref<4x16x1xf32, #tpu.memory_space<vmem>>, vector<1x16x1xf32>
    %161 = vector.shape_cast %160 : vector<1x16x1xf32> to vector<16x1xf32>
    %162 = vector.broadcast %161 : vector<16x1xf32> to vector<16x16xf32>
    %163 = arith.addf %159, %162 : vector<16x16xf32>
    %164 = vector.extract_strided_slice %163 {offsets = [0, 0], sizes = [8, 16], strides = [1, 1]} : vector<16x16xf32> to vector<8x16xf32>
    %165 = math.tanh %164 : vector<8x16xf32>
    %166 = vector.extract_strided_slice %163 {offsets = [8, 0], sizes = [8, 16], strides = [1, 1]} : vector<16x16xf32> to vector<8x16xf32>
    %167 = vector.broadcast %139 : vector<8x1xf32> to vector<8x16xf32>
    %168 = arith.mulf %132, %167 : vector<8x16xf32>
    %169 = arith.subf %132, %166 : vector<8x16xf32>
    %170 = vector.broadcast %141 : vector<8x1xf32> to vector<8x16xf32>
    %171 = arith.mulf %170, %169 : vector<8x16xf32>
    %cst_85 = arith.constant 0.000000e+00 : f32
    %172 = vector.broadcast %cst_85 : f32 to vector<8x16xf32>
    %173 = arith.subf %172, %165 : vector<8x16xf32>
    %174 = math.exp %173 : vector<8x16xf32>
    %175 = arith.mulf %171, %174 : vector<8x16xf32>
    %176 = arith.addf %168, %175 : vector<8x16xf32>
    %177 = vector.broadcast %141 : vector<8x1xf32> to vector<8x16xf32>
    %178 = arith.mulf %177, %165 : vector<8x16xf32>
    %cst_86 = arith.constant dense<0.000000e+00> : vector<16xf32>
    %179 = vector.multi_reduction <add>, %178, %cst_86 [0] : vector<8x16xf32> to vector<16xf32>
    %180 = vector.shape_cast %179 : vector<16xf32> to vector<1x16xf32>
    %181 = arith.subf %137, %180 : vector<1x16xf32>
    %182 = arith.mulf %176, %176 : vector<8x16xf32>
    %cst_87 = arith.constant dense<0.000000e+00> : vector<16xf32>
    %183 = vector.multi_reduction <add>, %182, %cst_87 [0] : vector<8x16xf32> to vector<16xf32>
    %184 = vector.shape_cast %183 : vector<16xf32> to vector<1x16xf32>
    %cst_88 = arith.constant -5.000000e-01 : f32
    %185 = vector.broadcast %cst_88 : f32 to vector<1x16xf32>
    %186 = arith.mulf %185, %184 : vector<1x16xf32>
    %cst_89 = arith.constant 8.000000e+00 : f32
    %cst_90 = arith.constant 0.918938517 : f32
    %187 = arith.mulf %cst_89, %cst_90 : f32
    %188 = vector.broadcast %187 : f32 to vector<1x16xf32>
    %189 = arith.subf %186, %188 : vector<1x16xf32>
    %190 = arith.addf %189, %181 : vector<1x16xf32>
    %c0_91 = arith.constant 0 : index
    %c0_92 = arith.constant 0 : index
    %191 = vector.load %arg9[%c0_91, %c0_92] : memref<1x16xf32, #tpu.memory_space<vmem>>, vector<1x16xf32>
    tpu.vector_store %arg9[%c0_91, %c0_92], %190 {strides = array<i32>} : memref<1x16xf32, #tpu.memory_space<vmem>>, vector<1x16xf32>,
    return
  }
  func.func @transform_0(%arg0: i32) -> (i32, i32) {
    %c0_i32 = arith.constant 0 : i32
    %c0_i32_0 = arith.constant 0 : i32
    return %c0_i32, %arg0 : i32, i32
  }
  func.func @transform_1(%arg0: i32) -> (i32, i32) {
    %c0_i32 = arith.constant 0 : i32
    %c0_i32_0 = arith.constant 0 : i32
    return %c0_i32, %arg0 : i32, i32
  }
  func.func @transform_2(%arg0: i32) -> (i32, i32, i32) {
    %c0_i32 = arith.constant 0 : i32
    %c0_i32_0 = arith.constant 0 : i32
    %c0_i32_1 = arith.constant 0 : i32
    %c0_i32_2 = arith.constant 0 : i32
    return %c0_i32, %c0_i32_0, %c0_i32_1 : i32, i32, i32
  }
  func.func @transform_3(%arg0: i32) -> (i32, i32, i32) {
    %c0_i32 = arith.constant 0 : i32
    %c0_i32_0 = arith.constant 0 : i32
    %c0_i32_1 = arith.constant 0 : i32
    %c0_i32_2 = arith.constant 0 : i32
    return %c0_i32, %c0_i32_0, %c0_i32_1 : i32, i32, i32
  }
  func.func @transform_4(%arg0: i32) -> (i32, i32) {
    %c0_i32 = arith.constant 0 : i32
    %c0_i32_0 = arith.constant 0 : i32
    %c0_i32_1 = arith.constant 0 : i32
    return %c0_i32, %c0_i32_0 : i32, i32
  }
  func.func @transform_5(%arg0: i32) -> (i32, i32, i32) {
    %c0_i32 = arith.constant 0 : i32
    %c0_i32_0 = arith.constant 0 : i32
    %c0_i32_1 = arith.constant 0 : i32
    %c0_i32_2 = arith.constant 0 : i32
    return %c0_i32, %c0_i32_0, %c0_i32_1 : i32, i32, i32
  }
  func.func @transform_6(%arg0: i32) -> (i32, i32, i32) {
    %c0_i32 = arith.constant 0 : i32
    %c0_i32_0 = arith.constant 0 : i32
    %c0_i32_1 = arith.constant 0 : i32
    %c0_i32_2 = arith.constant 0 : i32
    return %c0_i32, %c0_i32_0, %c0_i32_1 : i32, i32, i32
  }
  func.func @transform_7(%arg0: i32) -> (i32, i32, i32) {
    %c0_i32 = arith.constant 0 : i32
    %c0_i32_0 = arith.constant 0 : i32
    %c0_i32_1 = arith.constant 0 : i32
    %c0_i32_2 = arith.constant 0 : i32
    return %c0_i32, %c0_i32_0, %c0_i32_1 : i32, i32, i32
  }
  func.func @transform_8(%arg0: i32) -> (i32, i32) {
    %c0_i32 = arith.constant 0 : i32
    %c0_i32_0 = arith.constant 0 : i32
    return %c0_i32, %arg0 : i32, i32
  }
}

</mosaic_0001>

<bundles_post_ra>
// kernel: tpu_custom_call.1
= control target key start
LH: loop header
LB: loop body
LE: loop exit
PB: predicated region body
PF: predicated region fallthrough
CT: control target
= control target key end

     0   :  { %v1339_v1 = vmov 0   ;;  %vm115_vm0 = vcmask 1041408   ;;  %vm90_vm1 = vcmask 31744   ;;  %vm239_vm2 = vcmask 64512   ;;  %s1659_s0 = inlined_call_operand.vmem [shape: f32[8,16], index: 0, kind: input, shape index: {}]   ;;  %s1660_s1 = inlined_call_operand.vmem [shape: f32[4,16], index: 1, kind: input, shape index: {}]   ;;  %s1661_s2 = inlined_call_operand.vmem [shape: f32[4,8,1], index: 2, kind: input, shape index: {}]   ;;  %s1662_s3 = inlined_call_operand.vmem [shape: bf16[4,32,8], index: 3, kind: input, shape index: {}]   ;;  %s1663_s4 = inlined_call_operand.vmem [shape: bf16[128,4], index: 4, kind: input, shape index: {}]   ;;  %s1664_s5 = inlined_call_operand.vmem [shape: f32[4,32,1], index: 5, kind: input, shape index: {}]   ;;  %s1665_s6 = inlined_call_operand.vmem [shape: bf16[4,16,32], index: 6, kind: input, shape index: {}]   ;;  %s1666_s7 = inlined_call_operand.vmem [shape: f32[4,16,1], index: 7, kind: input, shape index: {}]   ;;  %s1667_s8 = inlined_call_operand.hbm [shape: f32[1,16], index: 8, kind: output, shape index: {}]  }
   0x1   :  { %v216_v0 = vld [vmem:[%s1661_s2] sm:$0xff]  ;;  %1277 = vset.pattern.permute.xlu0 %v1339_v1  ;;  %1278 = vset.pattern.permute.xlu1 %v1339_v1  ;;  %v302_v6 = vld [vmem:[%s1664_s5 + $0x18] sm:$0xff]  ;;  %v1280_v8 = vld [vmem:[%s1663_s4 + $0x8] sm:$0xff]  }
   0x2   :  { %220 = vperm.xlu0 %1277, %v216_v0   ;;  %v299_v2 = vld [vmem:[%s1664_s5] sm:$0xff]  ;;  %v1281_v9 = vld [vmem:[%s1663_s4 + $0x10] sm:$0xff]   ;;  %v336_v10 = vld [vmem:[%s1666_s7 + $0x8] sm:$0xff] }
   0x3   :  { %v32_v3 = vld [vmem:[%s1660_s1] sm:$0xf]  ;;  %v1084_v11 = vld [vmem:[%s1661_s2 + $0x8] sm:$0xff]  ;;  %v1282_v12 = vld [vmem:[%s1663_s4 + $0x18] sm:$0xff]  }
   0x4   :  { %v33_v4 = vpack.c.bf16 %v32_v3, %v32_v3  ;;  %v1279_v5 = vld [vmem:[%s1663_s4] sm:$0xff]   ;;  %v1094_v14 = vld [vmem:[%s1664_s5 + $0x28] sm:$0xff] }
   0x5   :  { %1177 = vmatprep.mubr.msk.bf16.mxu0 %vm90_vm1, %v1279_v5  ;;  %v1283_v13 = vld [vmem:[%s1662_s3] sm:$0xff]  }
   0x6   :  { %305 = vperm.xlu0 %1277, %v299_v2   ;;  %1267 = vmatprep.subr.msk.bf16.mxu0 %vm115_vm0, %v33_v4  ;;  %v117_v7 = vsel %vm115_vm0, %v33_v4, 0 }
   0x7   :  { %1176 = vmatpush3.bf16.msra.mxu0 %v117_v7  ;;  %1268 = vmatprep.subr.msk.bf16.mxu1 %vm115_vm0, %v33_v4 }
   0x8   :  { %1250 = vmatpush3.bf16.msra.mxu1 %v117_v7 }
   0xa   :  { %320 = vperm.xlu0 %1277, %v302_v6   ;;  %1178 = vmatmul.mubr.msk.bf16.vlgmr.msra.gmra.mrb[0].mxu0 %vm90_vm1, %v1280_v8 }
   0xb   :  { %1181 = vmatprep.mubr.msk.bf16.mxu0 %vm90_vm1, %v1281_v9 }
   0xe   :  { %344 = vperm.xlu0 %1277, %v336_v10  }
  0x12   :  { %425 = vperm.xlu0 %1277, %v1084_v11   ;;  %1182 = vmatmul.mubr.msk.bf16.gmra.mrb[4].mxu0 %vm90_vm1, %v1282_v12 }
  0x13   :  { %1195 = vmatprep.mubr.msk.bf16.mxu0 %vm239_vm2, %v1283_v13 }
  0x14   :  { %13 = vsyncpa [#allocation3], 0  ;;  %v1096_v15 = vld [vmem:[%s1664_s5 + $0x38] sm:$0xff]  ;;  %v1103_v17 = vld [vmem:[%s1661_s2 + $0x10] sm:$0xff]  ;;  %v217_v24 = vsub.f32 1.0, %v216_v0  ;;  %v422_v32 = vsub.f32 1.0, %v1084_v11 }
  0x15   :  { %v1100_v16 = vld [vmem:[%s1666_s7 + $0x18] sm:$0xff]  ;;  %v1113_v18 = vld [vmem:[%s1664_s5 + $0x48] sm:$0xff]  ;;  %v301_v21 = vld [vmem:[%s1664_s5 + $0x10] sm:$0xff]  ;;  %v627_v36 = vsub.f32 1.0, %v1103_v17  ;;  %vm246_vm3 = vcmask 1043456   ;;  %v1340_v51 = vmov 0.0  }
  0x16   :  { %515 = vperm.xlu0 %1277, %v1094_v14   ;;  %v300_v19 = vld [vmem:[%s1664_s5 + $0x8] sm:$0xff]  ;;  %v1115_v20 = vld [vmem:[%s1664_s5 + $0x58] sm:$0xff]  ;;  %v335_v23 = vld [vmem:[%s1666_s7] sm:$0xff]  ;;  %1199 = vmatprep.subr.bf16.mxu1 %v1340_v51  ;;  %vm1341_vm4 = vmmov 0   ;;  %vm352_vm5 = vcmask 261120   ;;  %vm411_vm6 = vcmask 130048  }
  0x17   :  { %310 = vperm.xlu1 %1278, %v300_v19   ;;  %v1119_v22 = vld [vmem:[%s1666_s7 + $0x28] sm:$0xff]  ;;  %v1122_v25 = vld [vmem:[%s1661_s2 + $0x18] sm:$0xff]  ;;  %v1093_v27 = vld [vmem:[%s1664_s5 + $0x20] sm:$0xff]  ;;  %vm1046_vm7 = vcmask 122880  }
  0x18   :  { %v1132_v26 = vld [vmem:[%s1664_s5 + $0x68] sm:$0xff]  ;;  %v1134_v28 = vld [vmem:[%s1664_s5 + $0x78] sm:$0xff]  ;;  %v1095_v29 = vld [vmem:[%s1664_s5 + $0x30] sm:$0xff]  ;;  %v832_v41 = vsub.f32 1.0, %v1122_v25 }
  0x19   :  { %v1138_v30 = vld [vmem:[%s1666_s7 + $0x38] sm:$0xff]  ;;  %v1099_v31 = vld [vmem:[%s1666_s7 + $0x10] sm:$0xff]  ;;  %v1112_v33 = vld [vmem:[%s1664_s5 + $0x40] sm:$0xff] }
  0x1a   :  { %525 = vperm.xlu0 %1277, %v1096_v15   ;;  %v1114_v34 = vld [vmem:[%s1664_s5 + $0x50] sm:$0xff]  ;;  %v1118_v35 = vld [vmem:[%s1666_s7 + $0x20] sm:$0xff]  ;;  %v1284_v47 = vld [vmem:[%s1662_s3 + $0x8] sm:$0xff]  }
  0x1b   :  { %315 = vperm.xlu1 %1278, %v301_v21   ;;  %v1131_v37 = vld [vmem:[%s1664_s5 + $0x60] sm:$0xff]  ;;  %v1133_v38 = vld [vmem:[%s1664_s5 + $0x70] sm:$0xff]  ;;  %v1286_v48 = vld [vmem:[%s1663_s4 + $0x28] sm:$0xff]  }
  0x1c   :  { %v1285_v39 = vld [vmem:[%s1663_s4 + $0x20] sm:$0xff]   ;;  %v1137_v40 = vld [vmem:[%s1666_s7 + $0x30] sm:$0xff]  ;;  %v1288_v50 = vld [vmem:[%s1663_s4 + $0x38] sm:$0xff]  }
  0x1d   :  { %1185 = vmatprep.mubr.msk.bf16.mxu1 %vm90_vm1, %v1285_v39  ;;  %v1502_v42 = vld [vmem:[%s1659_s0] sm:$0xff]  ;;  %v1287_v49 = vld [vmem:[%s1663_s4 + $0x30] sm:$0xff]  }
  0x1e   :  { %551 = vperm.xlu0 %1277, %v1100_v16   ;;  %1186 = vmatmul.mubr.msk.bf16.vlgmr.msra.gmra.mrb[0].mxu1 %vm90_vm1, %v1286_v48  ;;  %v1289_v6 = vld [vmem:[%s1665_s6] sm:$0xff]   ;;  %v1290_v15 = vld [vmem:[%s1662_s3 + $0x10] sm:$0xff]  }
  0x1f   :  { %339 = vperm.xlu1 %1278, %v335_v23   ;;  %1189 = vmatprep.mubr.msk.bf16.mxu1 %vm90_vm1, %v1287_v49 }
  0x22   :  { %630 = vperm.xlu0 %1277, %v1103_v17  }
  0x23   :  { %401 = vperm.xlu1 %1278, %v217_v24  }
  0x26   :  { %720 = vperm.xlu0 %1277, %v1113_v18   ;;  %1190 = vmatmul.mubr.msk.bf16.gmra.mrb[4].mxu1 %vm90_vm1, %v1288_v50 }
  0x27   :  { %510 = vperm.xlu1 %1278, %v1093_v27   ;;  %1203 = vmatprep.mubr.msk.bf16.mxu1 %vm1341_vm4, %v1340_v51 }
  0x2a   :  { %730 = vperm.xlu0 %1277, %v1115_v20  }
  0x2b   :  { %520 = vperm.xlu1 %1278, %v1095_v29  }
  0x2e   :  { %756 = vperm.xlu0 %1277, %v1119_v22  }
  0x2f   :  { %546 = vperm.xlu1 %1278, %v1099_v31  }
  0x32   :  { %835 = vperm.xlu0 %1277, %v1122_v25  }
  0x33   :  { %607 = vperm.xlu1 %1278, %v422_v32  }
  0x36   :  { %925 = vperm.xlu0 %1277, %v1132_v26  }
  0x37   :  { %715 = vperm.xlu1 %1278, %v1112_v33  }
  0x3a   :  { %935 = vperm.xlu0 %1277, %v1134_v28  }
  0x3b   :  { %725 = vperm.xlu1 %1278, %v1114_v34  }
  0x3e   :  { %961 = vperm.xlu0 %1277, %v1138_v30  }
  0x3f   :  { %751 = vperm.xlu1 %1278, %v1118_v35  }
  0x43   :  { %812 = vperm.xlu1 %1278, %v627_v36  }
  0x47   :  { %920 = vperm.xlu1 %1278, %v1131_v37   ;;  %v1291_v37 = vld [vmem:[%s1662_s3 + $0x18] sm:$0xff]  }
  0x4b   :  { %930 = vperm.xlu1 %1278, %v1133_v38  }
  0x4f   :  { %956 = vperm.xlu1 %1278, %v1137_v40  }
  0x53   :  { %1017 = vperm.xlu1 %1278, %v832_v41  }
  0x81   :  { %v221_v43 = vpop.permute.xlu0 %220 }
  0x82   :  { %v1505_v44 = vmul.f32 %v221_v43, %v1502_v42 }
  0x84   :  { %v224_v45 = vpack.c.bf16 %v1505_v44, %v1505_v44 }
  0x85   :  { %v306_v53 = vpop.permute.xlu0 %305 }
  0x86   :  { %1269 = vmatprep.subr.msk.bf16.mxu0 %vm246_vm3, %v224_v45  ;;  %v248_v46 = vsel %vm246_vm3, %v224_v45, 0 }
  0x87   :  { %1194 = vmatpush3.bf16.msra.mxu0 %v248_v46 }
  0x89   :  { %v321_v58 = vpop.permute.xlu0 %320 }
  0x8a   :  { %1196 = vmatmul.mubr.msk.bf16.vlgmr.msra.gmra.mrb[0].mxu0 %vm239_vm2, %v1284_v47 }
  0x8b   :  { %1209 = vmatprep.mubr.msk.bf16.mxu0 %vm239_vm2, %v1290_v15 }
  0x8d   :  { %v345_v25 = vpop.permute.xlu0 %344 }
  0x91   :  { %v426_v33 = vpop.permute.xlu0 %425 }
  0x95   :  { %v516_v39 = vpop.permute.xlu0 %515 }
  0x96   :  { %v311_v52 = vpop.permute.xlu1 %310 }
  0x9a   :  { %v316_v54 = vpop.permute.xlu1 %315 }
  0x9e   :  { %v340_v16 = vpop.permute.xlu1 %339 }
  0xa2   :  { %v402_v28 = vpop.permute.xlu1 %401 }
  0xa6   :  { %v511_v38 = vpop.permute.xlu1 %510 }
  0xaa   :  { %v521_v40 = vpop.permute.xlu1 %520 }
  0xf1   :  { %v1538_v7 = vpop.f32.mrb[0].mxu1 }
  0xf2   :  { %v1540_v8 = vpop.f32.mrb[1].mxu1 }
  0xf3   :  { %v1542_v9 = vpop.f32.mrb[2].mxu1 }
  0xf4   :  { %v1544_v10 = vpop.f32.mrb[3].mxu1 }
  0xf9   :  { %v1546_v11 = vpop.f32.mrb[4].mxu1 }
  0xfa   :  { %v1548_v12 = vpop.f32.mrb[5].mxu1 }
  0xfb   :  { %v1550_v13 = vpop.f32.mrb[6].mxu1 }
  0xfc   :  { %v1552_v14 = vpop.f32.mrb[7].mxu1 }
 0x15d   :  { %v1197_v55 = vpop.f32.mrb[0].mxu0 }
 0x15e   :  { %v325_v56 = vadd.f32 %v1197_v55, %v316_v54  ;;  %v284_v57 = vpop.f32.mrb[1].mxu0 }
 0x15f   :  { %v323_v59 = vadd.f32 %v306_v53, %v284_v57  ;;  %v1198_v60 = vpop.f32.mrb[2].mxu0  ;;  %v1292_v57 = vld [vmem:[%s1665_s6 + $0x8] sm:$0xff]  }
 0x160   :  { %v326_v61 = vadd.f32 %v1198_v60, %v321_v58  ;;  %v287_v62 = vpop.f32.mrb[3].mxu0  ;;  %v329_v0 = vmax.f32 %v325_v56, 0.0  ;;  %v1293_v58 = vld [vmem:[%s1662_s3 + $0x20] sm:$0xff]   ;;  %v547_v60 = vpop.permute.xlu1 %546 }
 0x161   :  { %v324_v63 = vadd.f32 %v311_v52, %v287_v62  ;;  %v327_v2 = vmax.f32 %v323_v59, 0.0 }
 0x162   :  { %v330_v1 = vmax.f32 %v326_v61, 0.0 }
 0x163   :  { %v328_v3 = vmax.f32 %v324_v63, 0.0 }
 0x164   :  { %v334_v4 = vpack.c.bf16 %v330_v1, %v329_v0  ;;  %v608_v15 = vpop.permute.xlu1 %607 }
 0x165   :  { %v333_v5 = vpack.c.bf16 %v328_v3, %v327_v2 }
 0x167   :  { %1200 = vmatpush3.bf16.msra.mxu1 %v333_v5 }
 0x168   :  { %1201 = vmatprep.subr.bf16.mxu1 %v1340_v51 }
 0x16b   :  { %1202 = vmatpush3.bf16.msra.mxu1 %v334_v4 }
 0x16c   :  { %1213 = vmatprep.subr.bf16.mxu1 %v1340_v51 }
 0x16e   :  { %1204 = vmatmul.mubr.msk.bf16.vlgmr.msra.gmra.mrb[8].mxu1 %vm352_vm5, %v1289_v6 }
 0x16f   :  { %1217 = vmatprep.mubr.msk.bf16.mxu1 %vm1341_vm4, %v1340_v51 }
 0x241   :  { %v390_v17 = vpop.f32.mrb[8].mxu1 }
 0x242   :  { %v391_v18 = vadd.f32 %v390_v17, %v340_v16  ;;  %v1205_v19 = vpop.f32.mrb[9].mxu1 }
 0x243   :  { %v393_v20 = vpop.f32.mrb[10].mxu1 }
 0x244   :  { %1299 = vtanh.f32 %v391_v18  ;;  %v1206_v21 = vpop.f32.mrb[11].mxu1  ;;  %v394_v26 = vadd.f32 %v393_v20, %v345_v25 }
 0x246   :  { %v398_v27 = vsub.f32 %v1502_v42, %v394_v26 }
 0x248   :  { %v404_v29 = vmul.f32 %v402_v28, %v398_v27 }
 0x24e   :  { %v1300_v22 = vpop.eup %1299 }
 0x24f   :  { %v405_v23 = vsub.f32 0.0, %v1300_v22  ;;  %v410_v59 = vmul.f32 %v1300_v22, %v402_v28 }
 0x251   :  { %v406_v24 = vmul.f32 1.442695, %v405_v23  ;;  %v412_v61 = vsel %vm411_vm6, %v410_v59, 0.0 }
 0x252   :  { %v413_v2 = vrot.slane %v412_v61, 4 }
 0x253   :  { %1301 = vpow2.f32 %v406_v24 }
 0x254   :  { %v414_v4 = vadd.f32 %v413_v2, %v412_v61 }
 0x256   :  { %v415_v5 = vrot.slane %v414_v4, 2 }
 0x258   :  { %v416_v18 = vadd.f32 %v415_v5, %v414_v4 }
 0x25a   :  { %v417_v25 = vrot.slane %v416_v18, 1 }
 0x25c   :  { %v418_v28 = vadd.f32 %v417_v25, %v416_v18 }
 0x25d   :  { %v1302_v30 = vpop.eup %1301 }
 0x25e   :  { %v408_v31 = vmul.f32 %v1302_v30, %v404_v29 }
 0x260   :  { %v1560_v32 = vadd.f32 %v408_v31, %v1505_v44  ;;  %v526_v44 = vpop.permute.xlu0 %525 }
 0x262   :  { %v1563_v34 = vmul.f32 %v426_v33, %v1560_v32  ;;  %v419_v33 = vsub.f32 0.0, %v418_v28 }
 0x264   :  { %v429_v35 = vpack.c.bf16 %v1563_v34, %v1563_v34  ;;  %v552_v22 = vpop.permute.xlu0 %551 }
 0x266   :  { %1270 = vmatprep.subr.msk.bf16.mxu0 %vm246_vm3, %v429_v35  ;;  %v452_v36 = vsel %vm246_vm3, %v429_v35, 0 }
 0x267   :  { %1208 = vmatpush3.bf16.msra.mxu0 %v452_v36 }
 0x26a   :  { %1210 = vmatmul.mubr.msk.bf16.vlgmr.msra.gmra.mrb[4].mxu0 %vm239_vm2, %v1291_v37 }
 0x26b   :  { %1223 = vmatprep.mubr.msk.bf16.mxu0 %vm239_vm2, %v1293_v58 }
 0x33d   :  { %v1211_v41 = vpop.f32.mrb[4].mxu0 }
 0x33e   :  { %v530_v42 = vadd.f32 %v1211_v41, %v521_v40  ;;  %v488_v43 = vpop.f32.mrb[5].mxu0  ;;  %v631_v40 = vpop.permute.xlu0 %630 }
 0x33f   :  { %v528_v45 = vadd.f32 %v511_v38, %v488_v43  ;;  %v1212_v46 = vpop.f32.mrb[6].mxu0  ;;  %v1294_v43 = vld [vmem:[%s1662_s3 + $0x28] sm:$0xff]  }
 0x340   :  { %v531_v47 = vadd.f32 %v1212_v46, %v526_v44  ;;  %v491_v48 = vpop.f32.mrb[7].mxu0  ;;  %v534_v50 = vmax.f32 %v530_v42, 0.0 }
 0x341   :  { %v529_v49 = vadd.f32 %v516_v39, %v491_v48  ;;  %v532_v53 = vmax.f32 %v528_v45, 0.0 }
 0x342   :  { %v535_v52 = vmax.f32 %v531_v47, 0.0  ;;  %v721_v44 = vpop.permute.xlu0 %720 }
 0x343   :  { %v533_v54 = vmax.f32 %v529_v49, 0.0 }
 0x344   :  { %v540_v55 = vpack.c.bf16 %v535_v52, %v534_v50 }
 0x345   :  { %v539_v56 = vpack.c.bf16 %v533_v54, %v532_v53 }
 0x347   :  { %1214 = vmatpush3.bf16.msra.mxu1 %v539_v56 }
 0x348   :  { %1215 = vmatprep.subr.bf16.mxu1 %v1340_v51 }
 0x34b   :  { %1216 = vmatpush3.bf16.msra.mxu1 %v540_v55  ;;  %v731_v55 = vpop.permute.xlu0 %730 }
 0x34c   :  { %1227 = vmatprep.subr.bf16.mxu1 %v1340_v51 }
 0x34e   :  { %1218 = vmatmul.mubr.msk.bf16.vlgmr.msra.gmra.mrb[12].mxu1 %vm352_vm5, %v1292_v57 }
 0x34f   :  { %1231 = vmatprep.mubr.msk.bf16.mxu1 %vm1341_vm4, %v1340_v51 }
 0x421   :  { %v596_v62 = vpop.f32.mrb[12].mxu1 }
 0x422   :  { %v597_v63 = vadd.f32 %v596_v62, %v547_v60  ;;  %v1219_v0 = vpop.f32.mrb[13].mxu1 }
 0x423   :  { %v599_v1 = vpop.f32.mrb[14].mxu1 }
 0x424   :  { %1303 = vtanh.f32 %v597_v63  ;;  %v1220_v3 = vpop.f32.mrb[15].mxu1  ;;  %v600_v24 = vadd.f32 %v599_v1, %v552_v22 }
 0x426   :  { %v604_v27 = vsub.f32 %v1560_v32, %v600_v24 }
 0x428   :  { %v610_v31 = vmul.f32 %v608_v15, %v604_v27 }
 0x42e   :  { %v1304_v6 = vpop.eup %1303 }
 0x42f   :  { %v611_v16 = vsub.f32 0.0, %v1304_v6  ;;  %v616_v17 = vmul.f32 %v1304_v6, %v608_v15 }
 0x431   :  { %v612_v19 = vmul.f32 1.442695, %v611_v16  ;;  %v617_v20 = vsel %vm411_vm6, %v616_v17, 0.0 }
 0x432   :  { %v618_v21 = vrot.slane %v617_v20, 4 }
 0x433   :  { %1305 = vpow2.f32 %v612_v19 }
 0x434   :  { %v619_v23 = vadd.f32 %v618_v21, %v617_v20  ;;  %v757_v21 = vpop.permute.xlu0 %756 }
 0x436   :  { %v620_v26 = vrot.slane %v619_v23, 2 }
 0x438   :  { %v621_v29 = vadd.f32 %v620_v26, %v619_v23 }
 0x43a   :  { %v622_v30 = vrot.slane %v621_v29, 1 }
 0x43c   :  { %v623_v35 = vadd.f32 %v622_v30, %v621_v29 }
 0x43d   :  { %v1306_v36 = vpop.eup %1305 }
 0x43e   :  { %v614_v37 = vmul.f32 %v1306_v36, %v610_v31  ;;  %v1588_v38 = vsub.f32 %v419_v33, %v623_v35  ;;  %v836_v36 = vpop.permute.xlu0 %835 }
 0x440   :  { %v1591_v39 = vadd.f32 %v614_v37, %v1563_v34  ;;  %v716_v34 = vpop.permute.xlu1 %715 }
 0x442   :  { %v1594_v41 = vmul.f32 %v631_v40, %v1591_v39 }
 0x444   :  { %v634_v32 = vpack.c.bf16 %v1594_v41, %v1594_v41  ;;  %v726_v48 = vpop.permute.xlu1 %725 }
 0x446   :  { %1271 = vmatprep.subr.msk.bf16.mxu0 %vm246_vm3, %v634_v32  ;;  %v657_v42 = vsel %vm246_vm3, %v634_v32, 0 }
 0x447   :  { %1222 = vmatpush3.bf16.msra.mxu0 %v657_v42 }
 0x44a   :  { %1224 = vmatmul.mubr.msk.bf16.vlgmr.msra.gmra.mrb[8].mxu0 %vm239_vm2, %v1294_v43  ;;  %v926_v43 = vpop.permute.xlu0 %925 }
 0x51d   :  { %v1225_v45 = vpop.f32.mrb[8].mxu0 }
 0x51e   :  { %v702_v46 = vadd.f32 %v1225_v45, %v1538_v7  ;;  %v693_v47 = vpop.f32.mrb[9].mxu0 }
 0x51f   :  { %v694_v49 = vadd.f32 %v693_v47, %v1540_v8  ;;  %v1226_v50 = vpop.f32.mrb[10].mxu0  ;;  %v1295_v8 = vld [vmem:[%s1665_s6 + $0x10] sm:$0xff]  }
 0x520   :  { %v735_v52 = vadd.f32 %v726_v48, %v702_v46  ;;  %v705_v53 = vadd.f32 %v1226_v50, %v1542_v9  ;;  %v696_v54 = vpop.f32.mrb[11].mxu0  ;;  %v1296_v9 = vld [vmem:[%s1662_s3 + $0x30] sm:$0xff]  }
 0x521   :  { %v733_v56 = vadd.f32 %v716_v34, %v694_v49  ;;  %v697_v57 = vadd.f32 %v696_v54, %v1544_v10  ;;  %1237 = vmatprep.mubr.msk.bf16.mxu0 %vm239_vm2, %v1296_v9  ;;  %v752_v10 = vpop.permute.xlu1 %751 }
 0x522   :  { %v736_v58 = vadd.f32 %v731_v55, %v705_v53  ;;  %v739_v60 = vmax.f32 %v735_v52, 0.0  ;;  %v936_v52 = vpop.permute.xlu0 %935 }
 0x523   :  { %v734_v59 = vadd.f32 %v721_v44, %v697_v57  ;;  %v737_v62 = vmax.f32 %v733_v56, 0.0 }
 0x524   :  { %v740_v61 = vmax.f32 %v736_v58, 0.0 }
 0x525   :  { %v738_v63 = vmax.f32 %v734_v59, 0.0  ;;  %v813_v15 = vpop.permute.xlu1 %812 }
 0x526   :  { %v745_v7 = vpack.c.bf16 %v740_v61, %v739_v60 }
 0x527   :  { %v744_v0 = vpack.c.bf16 %v738_v63, %v737_v62 }
 0x529   :  { %1228 = vmatpush3.bf16.msra.mxu1 %v744_v0  ;;  %v921_v42 = vpop.permute.xlu1 %920 }
 0x52a   :  { %1229 = vmatprep.subr.bf16.mxu1 %v1340_v51 }
 0x52d   :  { %1230 = vmatpush3.bf16.msra.mxu1 %v745_v7  ;;  %v931_v45 = vpop.permute.xlu1 %930 }
 0x52e   :  { %1241 = vmatprep.subr.bf16.mxu1 %v1340_v51 }
 0x530   :  { %1232 = vmatmul.mubr.msk.bf16.vlgmr.msra.gmra.mrb[16].mxu1 %vm352_vm5, %v1295_v8 }
 0x531   :  { %1245 = vmatprep.mubr.msk.bf16.mxu1 %vm1341_vm4, %v1340_v51 }
 0x603   :  { %v801_v1 = vpop.f32.mrb[16].mxu1 }
 0x604   :  { %v802_v2 = vadd.f32 %v801_v1, %v752_v10  ;;  %v1233_v3 = vpop.f32.mrb[17].mxu1 }
 0x605   :  { %v804_v4 = vpop.f32.mrb[18].mxu1 }
 0x606   :  { %1307 = vtanh.f32 %v802_v2  ;;  %v1234_v5 = vpop.f32.mrb[19].mxu1  ;;  %v805_v22 = vadd.f32 %v804_v4, %v757_v21  ;;  %v962_v4 = vpop.permute.xlu0 %961 }
 0x608   :  { %v809_v25 = vsub.f32 %v1591_v39, %v805_v22  ;;  %v1297_v39 = vld [vmem:[%s1662_s3 + $0x38] sm:$0xff]  }
 0x60a   :  { %v815_v28 = vmul.f32 %v813_v15, %v809_v25 }
 0x610   :  { %v1308_v6 = vpop.eup %1307 }
 0x611   :  { %v816_v16 = vsub.f32 0.0, %v1308_v6  ;;  %v821_v17 = vmul.f32 %v1308_v6, %v813_v15 }
 0x613   :  { %v817_v18 = vmul.f32 1.442695, %v816_v16  ;;  %v822_v19 = vsel %vm411_vm6, %v821_v17, 0.0 }
 0x614   :  { %v823_v20 = vrot.slane %v822_v19, 4 }
 0x615   :  { %1309 = vpow2.f32 %v817_v18 }
 0x616   :  { %v824_v23 = vadd.f32 %v823_v20, %v822_v19 }
 0x618   :  { %v825_v24 = vrot.slane %v824_v23, 2 }
 0x61a   :  { %v826_v26 = vadd.f32 %v825_v24, %v824_v23 }
 0x61c   :  { %v827_v27 = vrot.slane %v826_v26, 1 }
 0x61e   :  { %v1622_v29 = vadd.f32 %v827_v27, %v826_v26 }
 0x61f   :  { %v1310_v30 = vpop.eup %1309 }
 0x620   :  { %v819_v31 = vmul.f32 %v1310_v30, %v815_v28  ;;  %v829_v33 = vsub.f32 %v1588_v38, %v1622_v29 }
 0x622   :  { %v820_v35 = vadd.f32 %v819_v31, %v1594_v41 }
 0x624   :  { %v838_v37 = vmul.f32 %v836_v36, %v820_v35 }
 0x626   :  { %v839_v40 = vpack.c.bf16 %v838_v37, %v838_v37 }
 0x628   :  { %1272 = vmatprep.subr.msk.bf16.mxu0 %vm246_vm3, %v839_v40  ;;  %v862_v32 = vsel %vm246_vm3, %v839_v40, 0 }
 0x629   :  { %1236 = vmatpush3.bf16.msra.mxu0 %v862_v32 }
 0x62c   :  { %1238 = vmatmul.mubr.msk.bf16.vlgmr.msra.gmra.mrb[12].mxu0 %vm239_vm2, %v1297_v39 }
 0x6ff   :  { %v1239_v34 = vpop.f32.mrb[12].mxu0 }
 0x700   :  { %v907_v44 = vadd.f32 %v1239_v34, %v1546_v11  ;;  %v898_v41 = vpop.f32.mrb[13].mxu0 }
 0x701   :  { %v899_v46 = vadd.f32 %v898_v41, %v1548_v12  ;;  %v1240_v47 = vpop.f32.mrb[14].mxu0  ;;  %v1298_v12 = vld [vmem:[%s1665_s6 + $0x18] sm:$0xff]   ;;  %s1342_s6 = smov [#allocation2]  }
 0x702   :  { %v940_v48 = vadd.f32 %v931_v45, %v907_v44  ;;  %v910_v49 = vadd.f32 %v1240_v47, %v1550_v13  ;;  %v901_v50 = vpop.f32.mrb[15].mxu0  ;;  %v957_v13 = vpop.permute.xlu1 %956  ;;  %s1054_s28 = sshll.u32 %s1342_s6, 4  ;;  %s1055_s28 = int_to_ptr.vmem [resolvable:$true] %s1054_s28 }
 0x703   :  { %v938_v53 = vadd.f32 %v921_v42, %v899_v46  ;;  %v902_v54 = vadd.f32 %v901_v50, %v1552_v14  ;;  %s1315_s5 = scalar_lea.vmem %s1055_s28, 16  ;;  %s1319_s7 = scalar_lea.vmem %s1055_s28, 32 }
 0x704   :  { %v941_v55 = vadd.f32 %v936_v52, %v910_v49  ;;  %v944_v57 = vmax.f32 %v940_v48, 0.0  ;;  %p1316_p0 = scmp.ne.s32.totalorder %s1055_s28, %s1315_s5  ;;  %p1320_p1 = scmp.lt.s32.totalorder %s1055_s28, %s1055_s28 }
 0x705   :  { %v939_v56 = vadd.f32 %v926_v43, %v902_v54  ;;  %v942_v59 = vmax.f32 %v938_v53, 0.0  ;;  %p1321_p2 = scmp.lt.s32.totalorder %s1319_s7, %s1315_s5 }
 0x706   :  { %v945_v58 = vmax.f32 %v941_v55, 0.0  ;;  %v1018_v9 = vpop.permute.xlu1 %1017 }
 0x707   :  { %v943_v60 = vmax.f32 %v939_v56, 0.0  ;;  %p1322_p3 = por %p1321_p2, %p1320_p1 }
 0x708   :  { %v950_v11 = vpack.c.bf16 %v945_v58, %v944_v57 }
 0x709   :  { %v949_v61 = vpack.c.bf16 %v943_v60, %v942_v59  ;;  %p1323_p4 = pnand %p1322_p3, %p1316_p0 }
 0x70b   :  { %1242 = vmatpush3.bf16.msra.mxu1 %v949_v61 }
 0x70c   :  { %1243 = vmatprep.subr.bf16.mxu1 %v1340_v51 }
 0x70f   :  { %1244 = vmatpush3.bf16.msra.mxu1 %v950_v11 }
 0x712   :  { %1246 = vmatmul.mubr.msk.bf16.vlgmr.msra.gmra.mrb[20].mxu1 %vm352_vm5, %v1298_v12 }
 0x7e5   :  { %v1006_v14 = vpop.f32.mrb[20].mxu1 }
 0x7e6   :  { %v1007_v62 = vadd.f32 %v1006_v14, %v957_v13  ;;  %v1247_v63 = vpop.f32.mrb[21].mxu1 }
 0x7e7   :  { %v1009_v7 = vpop.f32.mrb[22].mxu1 }
 0x7e8   :  { %1311 = vtanh.f32 %v1007_v62  ;;  %v1248_v0 = vpop.f32.mrb[23].mxu1  ;;  %v1010_v5 = vadd.f32 %v1009_v7, %v962_v4 }
 0x7ea   :  { %v1014_v16 = vsub.f32 %v820_v35, %v1010_v5 }
 0x7ec   :  { %v1020_v19 = vmul.f32 %v1018_v9, %v1014_v16 }
 0x7f2   :  { %v1312_v8 = vpop.eup %1311 }
 0x7f3   :  { %v1021_v10 = vsub.f32 0.0, %v1312_v8  ;;  %v1026_v1 = vmul.f32 %v1312_v8, %v1018_v9 }
 0x7f5   :  { %v1022_v2 = vmul.f32 1.442695, %v1021_v10  ;;  %v1027_v51 = vsel %vm411_vm6, %v1026_v1, 0.0 }
 0x7f6   :  { %v1028_v3 = vrot.slane %v1027_v51, 4 }
 0x7f7   :  { %1313 = vpow2.f32 %v1022_v2 }
 0x7f8   :  { %v1029_v6 = vadd.f32 %v1028_v3, %v1027_v51 }
 0x7fa   :  { %v1030_v15 = vrot.slane %v1029_v6, 2 }
 0x7fc   :  { %v1031_v17 = vadd.f32 %v1030_v15, %v1029_v6 }
 0x7fe   :  { %v1032_v18 = vrot.slane %v1031_v17, 1 }
 0x800   :  { %v1033_v20 = vadd.f32 %v1032_v18, %v1031_v17 }
 0x801   :  { %v1314_v21 = vpop.eup %1313 }
 0x802   :  { %v1024_v22 = vmul.f32 %v1314_v21, %v1020_v19  ;;  %v1034_v23 = vsub.f32 %v829_v33, %v1033_v20 }
 0x804   :  { %v1025_v24 = vadd.f32 %v1024_v22, %v838_v37 }
 0x806   :  { %v1035_v25 = vmul.f32 %v1025_v24, %v1025_v24 }
 0x808   :  { %v1036_v26 = vsel %vm411_vm6, %v1035_v25, 0.0 }
 0x809   :  { %v1037_v27 = vrot.slane %v1036_v26, 4 }
 0x80b   :  { %v1038_v28 = vadd.f32 %v1037_v27, %v1036_v26 }
 0x80d   :  { %v1039_v30 = vrot.slane %v1038_v28, 2 }
 0x80f   :  { %v1040_v31 = vadd.f32 %v1039_v30, %v1038_v28 }
 0x811   :  { %v1041_v36 = vrot.slane %v1040_v31, 1 }
 0x813   :  { %v1042_v35 = vadd.f32 %v1041_v36, %v1040_v31 }
 0x815   :  { %v1043_v40 = vmul.f32 -0.5, %v1042_v35 }
 0x817   :  { %v1141_v32 = vadd.f32 -7.351508, %v1043_v40 }
 0x819   :  { %v1045_v39 = vadd.f32 %v1141_v32, %v1034_v23 }
 0x81b   :  { %1047 = vst.msk [vmem:[#allocation2] sm:$0x1] %vm1046_vm7, %v1045_v39 }
 0x81c   :  { %1326 = shalt.err (!%p1323_p4)
}
 0x81d   :  { %s1327_s30 = scalar_lea.hbm %s1667_s8, 16 }
 0x81e   :  { %p1328_p5 = scmp.ne.s32.totalorder %s1667_s8, %s1327_s30  ;;  %p1331_p6 = scmp.lt.u32.totalorder %s1327_s30, %s1667_s8 }
 0x820   :  { %p1333_p7 = pnand %p1331_p6, %p1328_p5 }
 0x822   :  { %1336 = shalt.err (!%p1333_p7)
}
 0x823   :  { %1057 = dma.vmem_to_hbm [thread:$0]  %s1055_s28, 16, %s1667_s8, [#allocation3]  }
 0x824   :  { %1337 = dma.done.wait [#allocation3], 16  }
 0x825   :  { %1338 = vsyncadd [#allocation3], 4294967280 }
 0x826   :  { %1061 = vsyncpa [#allocation3], 1 }

</bundles_post_ra>
